<compile_context>
chip_gen: v6e
topology: v6e:2x2x1
jax: 0.10.0
libtpu: 0.0.40
codegen_flags: <defaults>
</compile_context>

<pallas_src>
import functools

import jax
import jax.numpy as jnp
from jax.experimental import pallas as pl
from jax.experimental.pallas import tpu as pltpu


# ---------------------------------------------------------------------------
# Kernel body: one row-tile of x against the resident [nfeat, nclass] weight.
# ---------------------------------------------------------------------------
def _sgc_kernel(x_ref, w_ref, b_ref, o_ref):
    # x_ref: [TILE_M, nfeat], w_ref: [nfeat, nclass], b_ref: [1, nclass]
    acc = jnp.dot(x_ref[...], w_ref[...], preferred_element_type=jnp.float32)
    o_ref[...] = (acc + b_ref[...].astype(jnp.float32)).astype(o_ref.dtype)


# ---------------------------------------------------------------------------
# Helpers.
# ---------------------------------------------------------------------------
def _round_up(x, m):
    return ((x + m - 1) // m) * m


def _sublane_multiple(dtype):
    # 32-bit: 8 rows per vreg sublane tile; bf16: 16; int8/fp8: 32.
    itemsize = jnp.dtype(dtype).itemsize
    return max(8, 32 // max(1, itemsize))


@functools.lru_cache(maxsize=1)
def _vmem_capacity_bytes():
    """Physical VMEM of the current TPU generation (conservative fallback)."""
    try:
        info = pltpu.get_tpu_info()
        cap = getattr(info, "vmem_capacity_bytes", None)
        if cap:
            return int(cap)
    except Exception:
        pass
    return 64 << 20  # assume v7x-class (smallest) if the query fails


def _choose_tile_m(n, nfeat, nclass, x_dtype, out_dtype, vmem_cap):
    """Row tile sized so double-buffered (x + out) padded VMEM footprint fits
    a generation-aware budget, with >= 2 grid steps whenever N allows it."""
    sub = _sublane_multiple(x_dtype)
    x_itemsize = jnp.dtype(x_dtype).itemsize
    o_itemsize = jnp.dtype(out_dtype).itemsize

    # Padded (lane-rounded) per-row VMEM bytes of the streamed blocks.
    row_x_bytes = _round_up(nfeat, 128) * x_itemsize
    row_o_bytes = _round_up(nclass, 128) * o_itemsize

    # Pipeline budget for the double-buffered x + out streams.
    budget = (64 << 20) if vmem_cap >= (100 << 20) else (32 << 20)
    tile = budget // max(1, 2 * (row_x_bytes + row_o_bytes))

    # Never tile beyond what N needs.
    tile = min(tile, _round_up(n, sub))
    # Keep the grid >= 2 steps (v7x megacore) when N is large enough.
    half = _round_up(-(-n // 2), sub)
    tile = min(tile, max(sub, half))
    # Round down to the dtype sublane multiple.
    tile = max(sub, (tile // sub) * sub)
    return int(tile)


# ---------------------------------------------------------------------------
# Wrapper.
# ---------------------------------------------------------------------------
@functools.partial(jax.jit, static_argnames=("tile_m",))
def sgc_forward(x, weight, bias, *, tile_m=None):
    """x: [N, nfeat], weight: [nclass, nfeat] (PyTorch layout), bias: [nclass]."""
    n, nfeat = x.shape
    nclass = weight.shape[0]
    out_dtype = x.dtype

    x_itemsize = jnp.dtype(x.dtype).itemsize
    out_itemsize = jnp.dtype(out_dtype).itemsize
    b_itemsize = jnp.dtype(bias.dtype).itemsize

    vmem_cap = _vmem_capacity_bytes()
    if tile_m is None:
        tile_m = _choose_tile_m(n, nfeat, nclass, x.dtype, out_dtype, vmem_cap)

    # One-time transpose of the tiny weight -> canonical [K, N] MXU feed.
    w_t = weight.T.astype(x.dtype)          # [nfeat, nclass]
    b2 = bias.reshape(1, nclass)

    grid = (pl.cdiv(n, tile_m),)            # ragged last block handled by Pallas

    # VMEM limit estimate with padded block footprints (every BlockSpec gets
    # double buffers, including the constant-index weight/bias blocks), plus
    # margin; never clamped up to the full physical VMEM.
    sub_x = _sublane_multiple(x.dtype)
    lane_cls = _round_up(nclass, 128)
    lane_feat = _round_up(nfeat, 128)
    vmem_bytes = (
        2 * tile_m * lane_feat * x_itemsize                       # x stream
        + 2 * tile_m * lane_cls * out_itemsize                    # out stream
        + 2 * _round_up(nfeat, sub_x) * lane_cls * x_itemsize     # resident weight
        + 2 * 8 * lane_cls * b_itemsize                           # resident bias
        + (4 << 20)                                               # compiler scratch
    )
    vmem_limit_cap = (100 << 20) if vmem_cap >= (100 << 20) else (48 << 20)
    vmem_bytes = int(min(max(vmem_bytes, 16 << 20), vmem_limit_cap))

    cost = pl.CostEstimate(
        flops=2 * n * nfeat * nclass,
        transcendentals=0,
        bytes_accessed=(n * nfeat * x_itemsize
                        + n * nclass * out_itemsize
                        + nfeat * nclass * x_itemsize
                        + nclass * b_itemsize),
    )

    out = pl.pallas_call(
        _sgc_kernel,
        out_shape=jax.ShapeDtypeStruct((n, nclass), out_dtype),
        grid=grid,
        in_specs=[
            pl.BlockSpec((tile_m, nfeat), lambda i: (i, 0)),      # x: pipelined
            pl.BlockSpec((nfeat, nclass), lambda i: (0, 0)),      # weight: resident
            pl.BlockSpec((1, nclass), lambda i: (0, 0)),          # bias: resident
        ],
        out_specs=pl.BlockSpec((tile_m, nclass), lambda i: (i, 0)),
        compiler_params=pltpu.CompilerParams(
            dimension_semantics=("parallel",),                    # 2-TC shard on v7x
            vmem_limit_bytes=vmem_bytes,
        ),
        cost_estimate=cost,
    )(x, w_t, b2)

    return out


if __name__ == "__main__":
    # Small shapes consistent with the module: N nodes, nfeat features, nclass classes.
    N, NFEAT, NCLASS = 8, 32, 16

    key = jax.random.PRNGKey(0)
    kx, kw, kb = jax.random.split(key, 3)

    # Deterministic parameter init (mimics nn.Linear's uniform(-1/sqrt(nfeat), ...)).
    bound = 1.0 / (NFEAT ** 0.5)
    x = jax.random.normal(kx, (N, NFEAT), dtype=jnp.float32)
    weight = jax.random.uniform(kw, (NCLASS, NFEAT), minval=-bound, maxval=bound,
                                dtype=jnp.float32)
    bias = jax.random.uniform(kb, (NCLASS,), minval=-bound, maxval=bound,
                              dtype=jnp.float32)

    out = jax.block_until_ready(sgc_forward(x, weight, bias))
    ref = x @ weight.T + bias
    assert out.shape == (N, NCLASS)
    assert jnp.allclose(out, ref, atol=1e-5, rtol=1e-5)

    # Ragged-N path (no wrapper padding; Pallas clips the partial last block).
    N2 = 100
    x2 = jax.random.normal(jax.random.PRNGKey(1), (N2, NFEAT), dtype=jnp.float32)
    out2 = jax.block_until_ready(sgc_forward(x2, weight, bias))
    ref2 = x2 @ weight.T + bias
    assert out2.shape == (N2, NCLASS)
    assert jnp.allclose(out2, ref2, atol=1e-5, rtol=1e-5)

    # bf16 streaming path (input already bf16 upstream; no wrapper-side cast,
    # f32 MXU accumulation): exercises the 16-row sublane tile rounding.
    x3 = x2.astype(jnp.bfloat16)
    out3 = jax.block_until_ready(sgc_forward(x3, weight, bias))
    ref3 = (x3.astype(jnp.float32) @ weight.T.astype(jnp.bfloat16).astype(jnp.float32)
            + bias).astype(jnp.bfloat16)
    assert out3.shape == (N2, NCLASS)
    assert jnp.allclose(out3.astype(jnp.float32), ref3.astype(jnp.float32),
                        atol=2e-2, rtol=2e-2)

    print("KERNEL_OK")
</pallas_src>

<mosaic_0001>
module attributes {stable_mosaic.version = 11 : i64} {
  func.func @_sgc_kernel(%arg0: i32, %arg1: memref<8x32xf32, #tpu.memory_space<vmem>>, %arg2: memref<32x16xf32, #tpu.memory_space<vmem>>, %arg3: memref<1x16xf32, #tpu.memory_space<vmem>>, %arg4: memref<8x16xf32, #tpu.memory_space<vmem>>) attributes {dimension_semantics = [#tpu.dimension_semantics<parallel>], iteration_bounds = array<i64: 1>, scalar_prefetch = 0 : i64, scratch_operands = 0 : i64, tpu.core_type = #tpu.core_type<tc>, window_params = [{transform_indices = @transform_0, window_bounds = array<i64: 8, 32>}, {pipeline_mode = #tpu.pipeline_mode<synchronous>, transform_indices = @transform_1, window_bounds = array<i64: 32, 16>}, {pipeline_mode = #tpu.pipeline_mode<synchronous>, transform_indices = @transform_2, window_bounds = array<i64: 1, 16>}, {transform_indices = @transform_3, window_bounds = array<i64: 8, 16>}]} {
    %c0 = arith.constant 0 : index
    %c0_0 = arith.constant 0 : index
    %0 = vector.load %arg1[%c0, %c0_0] : memref<8x32xf32, #tpu.memory_space<vmem>>, vector<8x32xf32>
    %c0_1 = arith.constant 0 : index
    %c0_2 = arith.constant 0 : index
    %1 = vector.load %arg2[%c0_1, %c0_2] : memref<32x16xf32, #tpu.memory_space<vmem>>, vector<32x16xf32>
    %cst = arith.constant dense<0.000000e+00> : vector<8x16xf32>
    %2 = tpu.matmul %0, %1, %cst {dimension_numbers = #tpu.dot_dimension_numbers<[1], [0], [0], [1], [0, 0, 1, 1], [], []>} : vector<8x32xf32>, vector<32x16xf32>, vector<8x16xf32> -> vector<8x16xf32>
    %c0_3 = arith.constant 0 : index
    %c0_4 = arith.constant 0 : index
    %3 = vector.load %arg3[%c0_3, %c0_4] : memref<1x16xf32, #tpu.memory_space<vmem>>, vector<1x16xf32>
    %4 = vector.broadcast %3 : vector<1x16xf32> to vector<8x16xf32>
    %5 = arith.addf %2, %4 : vector<8x16xf32>
    %c0_5 = arith.constant 0 : index
    %c0_6 = arith.constant 0 : index
    %6 = vector.load %arg4[%c0_5, %c0_6] : memref<8x16xf32, #tpu.memory_space<vmem>>, vector<8x16xf32>
    tpu.vector_store %arg4[%c0_5, %c0_6], %5 {strides = array<i32>} : memref<8x16xf32, #tpu.memory_space<vmem>>, vector<8x16xf32>,
    return
  }
  func.func @transform_0(%arg0: i32) -> (i32, i32) {
    %c0_i32 = arith.constant 0 : i32
    %c0_i32_0 = arith.constant 0 : i32
    return %arg0, %c0_i32 : i32, i32
  }
  func.func @transform_1(%arg0: i32) -> (i32, i32) {
    %c0_i32 = arith.constant 0 : i32
    %c0_i32_0 = arith.constant 0 : i32
    %c0_i32_1 = arith.constant 0 : i32
    return %c0_i32, %c0_i32_0 : i32, i32
  }
  func.func @transform_2(%arg0: i32) -> (i32, i32) {
    %c0_i32 = arith.constant 0 : i32
    %c0_i32_0 = arith.constant 0 : i32
    %c0_i32_1 = arith.constant 0 : i32
    return %c0_i32, %c0_i32_0 : i32, i32
  }
  func.func @transform_3(%arg0: i32) -> (i32, i32) {
    %c0_i32 = arith.constant 0 : i32
    %c0_i32_0 = arith.constant 0 : i32
    return %arg0, %c0_i32 : i32, i32
  }
}

</mosaic_0001>

<bundles_post_ra>
// kernel: sgc_forward.1
= control target key start
LH: loop header
LB: loop body
LE: loop exit
PB: predicated region body
PF: predicated region fallthrough
CT: control target
= control target key end

     0   :  { %v160_v1 = vmov 0.0   ;;  %vm161_vm0 = vmmov 0   ;;  %s204_s0 = inlined_call_operand.vmem [shape: f32[8,32], index: 0, kind: input, shape index: {}]   ;;  %s205_s1 = inlined_call_operand.vmem [shape: f32[32,16], index: 1, kind: input, shape index: {}]   ;;  %s206_s2 = inlined_call_operand.vmem [shape: f32[1,16], index: 2, kind: input, shape index: {}]   ;;  %s207_s3 = inlined_call_operand.hbm [shape: f32[8,16], index: 3, kind: output, shape index: {}]  }
   0x1   :  { %v19_v0 = vld [vmem:[%s205_s1 + $0x18] sm:$0xff]  ;;  %124 = vmatprep.subr.mxu0 %v160_v1  ;;  %v18_v2 = vld [vmem:[%s205_s1 + $0x10] sm:$0xff]  ;;  %132 = vmatprep.mubr.msk.f32.mxu0 %vm161_vm0, %v160_v1 }
   0x2   :  { %125 = vmatpush3.msra.mxu0 %v19_v0 }
   0x3   :  { %8 = vsyncpa [#allocation3], 0  ;;  %126 = vmatprep.subr.mxu0 %v160_v1  ;;  %v17_v3 = vld [vmem:[%s205_s1 + $0x8] sm:$0xff]  ;;  %v16_v4 = vld [vmem:[%s205_s1] sm:$0xff]  ;;  %vm27_vm1 = vcmask 261120   ;;  %s162_s24 = smov [#allocation2]  }
   0x4   :  { %127 = vmatpush3.msra.mxu0 %v18_v2  ;;  %v15_v5 = vld [vmem:[%s204_s0] sm:$0xff]  ;;  %s109_s25 = sshll.u32 %s162_s24, 4  ;;  %vm101_vm2 = vcmask 130048   ;;  %s110_s25 = int_to_ptr.vmem [resolvable:$true] %s109_s25 }
   0x5   :  { %128 = vmatprep.subr.mxu0 %v160_v1  ;;  %v117_v6 = vld [vmem:[%s206_s2] ss:$0 sm:$0xff]  ;;  %s138_s1 = scalar_lea.vmem %s110_s25, 128  ;;  %p143_p1 = scmp.lt.s32.totalorder %s110_s25, %s110_s25 }
   0x6   :  { %129 = vmatpush3.msra.mxu0 %v17_v3  ;;  %p139_p0 = scmp.ne.s32.totalorder %s110_s25, %s138_s1  ;;  %p144_p2 = scmp.lt.s32.totalorder %s138_s1, %s138_s1 }
   0x7   :  { %130 = vmatprep.subr.mxu0 %v160_v1 }
   0x8   :  { %131 = vmatpush3.msra.mxu0 %v16_v4  ;;  %p145_p3 = por %p144_p2, %p143_p1 }
   0x9   :  { %133 = vmatmul.mubr.msk.f32.vlgmr.msra.gmra.mxu0 %vm27_vm1, %v15_v5 }
   0xa   :  { %p146_p4 = pnand %p145_p3, %p139_p0 }
  0xc9   :  { %v97_v7 = vpop.f32.mrf.mxu0 }
  0xca   :  { %v98_v8 = vadd.f32 %v117_v6, %v97_v7 }
  0xcb   :  { %v134_v9 = vpop.f32.mrf.mxu0 }
  0xcc   :  { %102 = vst.msk [vmem:[#allocation2] sm:$0xff] %vm101_vm2, %v98_v8 }
  0xcd   :  { %149 = shalt.err (!%p146_p4)
}
  0xce   :  { %112 = dma.vmem_to_hbm [thread:$0]  %s110_s25, 128, %s207_s3, [#allocation3]  }
  0xcf   :  { %158 = dma.done.wait [#allocation3], 128  }
  0xd0   :  { %159 = vsyncadd [#allocation3], 4294967168 }
  0xd1   :  { %116 = vsyncpa [#allocation3], 1 }

</bundles_post_ra>
